<compile_context>
chip_gen: v7x
topology: tpu7x:2x2x1
jax: 0.10.0
libtpu: 0.0.40
codegen_flags: <defaults>
</compile_context>

<pallas_src>
import functools

import jax
import jax.numpy as jnp
from jax.experimental import pallas as pl
from jax.experimental.pallas import tpu as pltpu

_MIB = 1024 * 1024


def _round_up(x, m):
    return ((x + m - 1) // m) * m


def _device_config():
    """(vmem_budget_bytes, vmem_hard_cap_bytes, is_v7x, is_v5e)."""
    try:
        kind = jax.devices()[0].device_kind.lower()
    except Exception:
        kind = ""
    if "v5 lite" in kind or "v5lite" in kind or "v5e" in kind:
        return 44 * _MIB, 100 * _MIB, False, True     # 128 MiB physical
    if "v7" in kind or "7x" in kind:
        return 30 * _MIB, 56 * _MIB, True, False      # 64 MiB per TensorCore
    return 56 * _MIB, 100 * _MIB, False, False        # v6e and others


def _tile_divisors(total, cap):
    """Multiples of 128 that divide `total` (a 128-multiple), descending."""
    lim = min(cap, total)
    return [d for d in range(lim - (lim % 128), 127, -128) if total % d == 0]


def _tile_footprint(tm, tn, tk, x_bytes, w_bytes, out_bytes, wbuf=2):
    """VMEM bytes for one pipelined grid step of the tiled matmul."""
    return (2 * tm * tk * x_bytes          # x double buffer
            + wbuf * tk * tn * w_bytes     # weight buffers
            + 2 * tm * tn * out_bytes      # output double buffer
            + tm * tn * 4                  # f32 accumulator scratch
            + 2 * tn * 4)                  # bias


# ---------------------------------------------------------------------------
# Kernels
# ---------------------------------------------------------------------------
def _linear_bias_kernel(x_ref, w_ref, b_ref, o_ref, acc_ref):
    k = pl.program_id(2)
    prod = jnp.dot(x_ref[...], w_ref[...], preferred_element_type=jnp.float32)

    @pl.when(k == 0)
    def _():
        acc_ref[...] = prod              # assign on first k step (no zero pass)

    @pl.when(k > 0)
    def _():
        acc_ref[...] += prod

    @pl.when(k == pl.num_programs(2) - 1)
    def _():
        o_ref[...] = (acc_ref[...]
                      + b_ref[...].astype(jnp.float32)).astype(o_ref.dtype)


def _linear_nobias_kernel(x_ref, w_ref, o_ref, acc_ref):
    k = pl.program_id(2)
    prod = jnp.dot(x_ref[...], w_ref[...], preferred_element_type=jnp.float32)

    @pl.when(k == 0)
    def _():
        acc_ref[...] = prod

    @pl.when(k > 0)
    def _():
        acc_ref[...] += prod

    @pl.when(k == pl.num_programs(2) - 1)
    def _():
        o_ref[...] = acc_ref[...].astype(o_ref.dtype)


# ---------------------------------------------------------------------------
# pallas_call builder + jitted wrapper
# ---------------------------------------------------------------------------
def _pallas_linear(x_pad, w_pad, b_pad, *, tm, tn, tk, wbuf, vmem_limit,
                   out_dtype):
    M_pad, K_pad = x_pad.shape
    _, N_pad = w_pad.shape
    grid = (M_pad // tm, N_pad // tn, K_pad // tk)

    x_spec = pl.BlockSpec((tm, tk), lambda i, j, k: (i, k))
    if wbuf == 2:
        w_spec = pl.BlockSpec((tk, tn), lambda i, j, k: (k, j))
    else:
        # Deeper buffering of the weight stream (decode / small-M regime).
        w_spec = pl.BlockSpec((tk, tn), lambda i, j, k: (k, j),
                              pipeline_mode=pl.Buffered(wbuf))
    out_spec = pl.BlockSpec((tm, tn), lambda i, j, k: (i, j))

    x_bytes = jnp.dtype(x_pad.dtype).itemsize
    w_bytes = jnp.dtype(w_pad.dtype).itemsize
    out_bytes = jnp.dtype(out_dtype).itemsize
    bytes_accessed = (M_pad * K_pad * x_bytes
                      + (M_pad // tm) * K_pad * N_pad * w_bytes
                      + M_pad * N_pad * out_bytes)
    cost = pl.CostEstimate(flops=2 * M_pad * K_pad * N_pad,
                           transcendentals=0,
                           bytes_accessed=int(bytes_accessed))

    common = dict(
        out_shape=jax.ShapeDtypeStruct((M_pad, N_pad), out_dtype),
        compiler_params=pltpu.CompilerParams(
            dimension_semantics=("parallel", "parallel", "arbitrary"),
            vmem_limit_bytes=int(vmem_limit),
        ),
        cost_estimate=cost,
    )

    if b_pad is not None:
        return pl.pallas_call(
            _linear_bias_kernel,
            grid_spec=pltpu.PrefetchScalarGridSpec(
                num_scalar_prefetch=0,
                grid=grid,
                in_specs=[x_spec, w_spec,
                          pl.BlockSpec((1, tn), lambda i, j, k: (0, j))],
                out_specs=out_spec,
                scratch_shapes=[pltpu.VMEM((tm, tn), jnp.float32)],
            ),
            **common,
        )(x_pad, w_pad, b_pad)

    return pl.pallas_call(
        _linear_nobias_kernel,
        grid_spec=pltpu.PrefetchScalarGridSpec(
            num_scalar_prefetch=0,
            grid=grid,
            in_specs=[x_spec, w_spec],
            out_specs=out_spec,
            scratch_shapes=[pltpu.VMEM((tm, tn), jnp.float32)],
        ),
        **common,
    )(x_pad, w_pad)


@functools.partial(
    jax.jit,
    static_argnames=("tm", "tn", "tk", "wbuf", "vmem_limit", "out_dtype",
                     "compute_dtype", "n_out"))
def _linear_fwd(x2d, w_pad, b_pad, *, tm, tn, tk, wbuf, vmem_limit, out_dtype,
                compute_dtype, n_out):
    M, K = x2d.shape
    K_pad, N_pad = w_pad.shape
    M_pad = _round_up(M, tm)

    # Cast BEFORE padding (half the bytes moved for bf16); skip no-op pads.
    if compute_dtype is not None and x2d.dtype != compute_dtype:
        x2d = x2d.astype(compute_dtype)
    if M_pad != M or K_pad != K:
        # Zero-padding K is exact (padded weight rows are also zero).
        x2d = jnp.pad(x2d, ((0, M_pad - M), (0, K_pad - K)))

    out = _pallas_linear(x2d, w_pad, b_pad, tm=tm, tn=tn, tk=tk, wbuf=wbuf,
                         vmem_limit=vmem_limit, out_dtype=out_dtype)

    if M_pad != M or N_pad != n_out:
        out = out[:M, :n_out]
    return out


# ---------------------------------------------------------------------------
# Module wrapper
# ---------------------------------------------------------------------------
class IpexFastLinearPallas:
    """JAX/Pallas equivalent of IpexFastLinear.

    `weight_t` is the pre-transposed (in_features, out_features) weight,
    exactly what port_data() produces.  `bias` is (out_features,) or None.

    NOTE: the MXU operands default to bf16 (compute_dtype=jnp.bfloat16) for
    throughput; accumulation is f32 and the output keeps the input dtype.
    Pass compute_dtype=jnp.float32 (or None) to reproduce the f32 reference
    numerics of the PyTorch module exactly.
    """

    def __init__(self, weight_t, bias=None, compute_dtype=jnp.bfloat16):
        K, N = weight_t.shape
        self.in_features = K
        self.out_features = N
        self.compute_dtype = compute_dtype

        (self._budget, self._vmem_cap,
         self._is_v7x, is_v5e) = _device_config()

        w_store = (weight_t if compute_dtype is None
                   else weight_t.astype(compute_dtype))
        cb = jnp.dtype(w_store.dtype).itemsize
        self._cb = cb                       # x / weight compute bytes
        self._out_bytes = 4                 # conservative (f32 output)

        # Activation-tile cap: bf16 on big-VMEM parts affords 1024 rows.
        if cb <= 2 and not self._is_v7x and not is_v5e:
            self._tm_cap = 1024
        else:
            self._tm_cap = 512
        self._tm_buckets = tuple(b for b in (64, 128, 256, 512, 1024)
                                 if b <= self._tm_cap)

        # Pad dims once to 128 multiples; tiles divide these exactly.
        K_pad = _round_up(K, 128)
        N_pad = _round_up(N, 128)
        self._K_pad, self._N_pad = K_pad, N_pad

        # ----- prefill tiles (sized against worst-case tm = tm_cap) --------
        tn_sel, tk_sel = 128, 128
        done = False
        for tn in _tile_divisors(N_pad, 512):
            for tk in _tile_divisors(K_pad, 2048):
                if _tile_footprint(self._tm_cap, tn, tk, cb, cb,
                                   self._out_bytes) <= self._budget:
                    tn_sel, tk_sel, done = tn, tk, True
                    break
            if done:
                break
        self._tn, self._tk = tn_sel, tk_sel

        # ----- decode tiles (M <= 32): feed the weight stream --------------
        self._tm_dec = 16 if cb <= 2 else 8
        tn_dec_cap = 1024
        if self._is_v7x and N_pad >= 256:
            tn_dec_cap = min(tn_dec_cap, N_pad // 2)   # keep >= 2 j blocks
        tn_divs = _tile_divisors(N_pad, tn_dec_cap) or [128]
        self._tn_dec = tn_divs[0]
        tk_dec = 128
        for tk in _tile_divisors(K_pad, 2048):
            if _tile_footprint(self._tm_dec, self._tn_dec, tk, cb, cb,
                               self._out_bytes, wbuf=3) <= self._budget:
                tk_dec = tk
                break
        self._tk_dec = tk_dec

        # Pad the weight (and bias) once; per-call work touches only x.
        self.weight = jnp.pad(w_store, ((0, K_pad - K), (0, N_pad - N)))
        if bias is not None:
            self.bias = jnp.pad(bias, (0, N_pad - N)).reshape(1, N_pad)
        else:
            self.bias = None

    def __call__(self, input_tensor):
        shape = tuple(input_tensor.shape[:-1]) + (self.out_features,)
        x2d = input_tensor.reshape(-1, self.in_features)   # flatten(0, -2)
        M = x2d.shape[0]

        if M <= 32:
            # Decode / GEMV-like regime: tiny tm, wide+deep weight tiles,
            # deeper weight buffering when the inner grid is long enough.
            tm, tn, tk = self._tm_dec, self._tn_dec, self._tk_dec
            inner_steps = (self._N_pad // tn) * (self._K_pad // tk)
            wbuf = 2
            if inner_steps >= 3 and _tile_footprint(
                    tm, tn, tk, self._cb, self._cb, self._out_bytes,
                    wbuf=3) <= self._budget:
                wbuf = 3
        else:
            tn, tk = self._tn, self._tk
            tm = self._tm_cap
            for b in self._tm_buckets:          # bucket tm -> few compiles
                if M <= b:
                    tm = b
                    break
            wbuf = 2

        fp = _tile_footprint(tm, tn, tk, self._cb, self._cb, self._out_bytes,
                             wbuf=wbuf)
        vmem_limit = min(self._vmem_cap, max(32 * _MIB, fp + 8 * _MIB))

        out2d = _linear_fwd(
            x2d, self.weight, self.bias,
            tm=tm, tn=tn, tk=tk, wbuf=wbuf, vmem_limit=int(vmem_limit),
            out_dtype=input_tensor.dtype,
            compute_dtype=self.compute_dtype,
            n_out=self.out_features)
        return out2d.reshape(shape)


# ---------------------------------------------------------------------------
# Demo / correctness check
# ---------------------------------------------------------------------------
if __name__ == "__main__":
    key = jax.random.PRNGKey(0)
    k_x, k_w, k_b, k_x2 = jax.random.split(key, 4)

    # --- case 1: 3-D input, bias, exact f32 path (addmm semantics) ---------
    batch, seq, hidden, out_features = 2, 8, 32, 64
    # torch nn.Linear stores weight as (out, in); port_data transposes it.
    w_out_in = jax.random.normal(k_w, (out_features, hidden), jnp.float32) * 0.05
    weight_t = jnp.transpose(w_out_in, (1, 0))            # (in, out)
    bias = jax.random.normal(k_b, (out_features,), jnp.float32) * 0.01
    x = jax.random.normal(k_x, (batch, seq, hidden), jnp.float32)

    layer_f32 = IpexFastLinearPallas(weight_t, bias, compute_dtype=jnp.float32)
    y = jax.block_until_ready(layer_f32(x))
    y_ref = (x.reshape(-1, hidden) @ weight_t + bias).reshape(
        batch, seq, out_features)
    assert y.shape == (batch, seq, out_features)
    assert jnp.allclose(y, y_ref, atol=1e-5, rtol=1e-5)

    # --- case 2: 2-D input, no bias (matmul path, no zero-bias DMA) --------
    layer_nb = IpexFastLinearPallas(weight_t, None, compute_dtype=jnp.float32)
    x2 = jax.random.normal(k_x2, (batch * seq, hidden), jnp.float32)
    y2 = jax.block_until_ready(layer_nb(x2))
    assert y2.shape == (batch * seq, out_features)
    assert jnp.allclose(y2, x2 @ weight_t, atol=1e-5, rtol=1e-5)

    # --- case 3: non-tile-divisible shapes (padding / remainder + slice) ---
    M3, K3, N3 = 300, 200, 260
    k_a, k_b2, k_c = jax.random.split(jax.random.PRNGKey(1), 3)
    w3 = jax.random.normal(k_a, (K3, N3), jnp.float32) * 0.05
    b3 = jax.random.normal(k_b2, (N3,), jnp.float32) * 0.01
    x3 = jax.random.normal(k_c, (M3, K3), jnp.float32)
    layer3 = IpexFastLinearPallas(w3, b3, compute_dtype=jnp.float32)
    y3 = jax.block_until_ready(layer3(x3))
    assert y3.shape == (M3, N3)
    assert jnp.allclose(y3, x3 @ w3 + b3, atol=1e-4, rtol=1e-4)

    # --- case 4: default bf16 MXU compute (f32 accumulation / f32 output) --
    layer_bf16 = IpexFastLinearPallas(weight_t, bias)     # bf16 by default
    y4 = jax.block_until_ready(layer_bf16(x))
    assert y4.dtype == x.dtype
    assert jnp.allclose(y4, y_ref, atol=5e-2, rtol=5e-2)

    # --- case 5: decode regime (M=4, long K) -> Buffered(3) weight stream --
    M5, K5, N5 = 4, 6144, 512
    k_w5, k_b5, k_x5 = jax.random.split(jax.random.PRNGKey(2), 3)
    w5 = jax.random.normal(k_w5, (K5, N5), jnp.float32) * 0.02
    b5 = jax.random.normal(k_b5, (N5,), jnp.float32) * 0.01
    x5 = jax.random.normal(k_x5, (M5, K5), jnp.float32)
    layer5 = IpexFastLinearPallas(w5, b5)                 # bf16 by default
    y5 = jax.block_until_ready(layer5(x5))
    ref5 = x5 @ w5 + b5
    assert y5.shape == (M5, N5)
    assert jnp.allclose(y5, ref5, atol=1e-1, rtol=1e-1)

    print("KERNEL_OK")
</pallas_src>

<mosaic_0001>
module attributes {stable_mosaic.version = 11 : i64} {
  func.func @_linear_bias_kernel(%arg0: i32, %arg1: i32, %arg2: i32, %arg3: memref<8x128xf32, #tpu.memory_space<vmem>>, %arg4: memref<128x128xf32, #tpu.memory_space<vmem>>, %arg5: memref<1x128xf32, #tpu.memory_space<vmem>>, %arg6: memref<8x128xf32, #tpu.memory_space<vmem>>, %arg7: memref<8x128xf32, #tpu.memory_space<vmem>>) attributes {dimension_semantics = [#tpu.dimension_semantics<parallel>, #tpu.dimension_semantics<parallel>, #tpu.dimension_semantics<arbitrary>], iteration_bounds = array<i64: 2, 1, 1>, scalar_prefetch = 0 : i64, scratch_operands = 1 : i64, tpu.core_type = #tpu.core_type<tc>, window_params = [{transform_indices = @transform_0, window_bounds = array<i64: 8, 128>}, {transform_indices = @transform_1, window_bounds = array<i64: 128, 128>}, {transform_indices = @transform_2, window_bounds = array<i64: 1, 128>}, {transform_indices = @transform_3, window_bounds = array<i64: 8, 128>}]} {
    %c0 = arith.constant 0 : index
    %c0_0 = arith.constant 0 : index
    %0 = vector.load %arg3[%c0, %c0_0] : memref<8x128xf32, #tpu.memory_space<vmem>>, vector<8x128xf32>
    %c0_1 = arith.constant 0 : index
    %c0_2 = arith.constant 0 : index
    %1 = vector.load %arg4[%c0_1, %c0_2] : memref<128x128xf32, #tpu.memory_space<vmem>>, vector<128x128xf32>
    %cst = arith.constant dense<0.000000e+00> : vector<8x128xf32>
    %2 = tpu.matmul %0, %1, %cst {dimension_numbers = #tpu.dot_dimension_numbers<[1], [0], [0], [1], [0, 0, 1, 1], [], []>} : vector<8x128xf32>, vector<128x128xf32>, vector<8x128xf32> -> vector<8x128xf32>
    %c0_i32 = arith.constant 0 : i32
    %3 = arith.cmpi eq, %arg2, %c0_i32 : i32
    %4 = arith.extui %3 : i1 to i32
    %c0_i32_3 = arith.constant 0 : i32
    %5 = arith.cmpi ne, %4, %c0_i32_3 : i32
    scf.if %5 {
      %c0_8 = arith.constant 0 : index
      %c0_9 = arith.constant 0 : index
      %12 = vector.load %arg7[%c0_8, %c0_9] : memref<8x128xf32, #tpu.memory_space<vmem>>, vector<8x128xf32>
      tpu.vector_store %arg7[%c0_8, %c0_9], %2 {strides = array<i32>} : memref<8x128xf32, #tpu.memory_space<vmem>>, vector<8x128xf32>,
    } else {
    }
    %c0_i32_4 = arith.constant 0 : i32
    %6 = arith.cmpi sgt, %arg2, %c0_i32_4 : i32
    %7 = arith.extui %6 : i1 to i32
    %c0_i32_5 = arith.constant 0 : i32
    %8 = arith.cmpi ne, %7, %c0_i32_5 : i32
    scf.if %8 {
      %c0_8 = arith.constant 0 : index
      %c0_9 = arith.constant 0 : index
      %12 = vector.load %arg7[%c0_8, %c0_9] : memref<8x128xf32, #tpu.memory_space<vmem>>, vector<8x128xf32>
      %13 = arith.addf %12, %2 : vector<8x128xf32>
      %c0_10 = arith.constant 0 : index
      %c0_11 = arith.constant 0 : index
      %14 = vector.load %arg7[%c0_10, %c0_11] : memref<8x128xf32, #tpu.memory_space<vmem>>, vector<8x128xf32>
      tpu.vector_store %arg7[%c0_10, %c0_11], %13 {strides = array<i32>} : memref<8x128xf32, #tpu.memory_space<vmem>>, vector<8x128xf32>,
    } else {
    }
    %c0_i32_6 = arith.constant 0 : i32
    %9 = arith.cmpi eq, %arg2, %c0_i32_6 : i32
    %10 = arith.extui %9 : i1 to i32
    %c0_i32_7 = arith.constant 0 : i32
    %11 = arith.cmpi ne, %10, %c0_i32_7 : i32
    scf.if %11 {
      %c0_8 = arith.constant 0 : index
      %c0_9 = arith.constant 0 : index
      %12 = vector.load %arg7[%c0_8, %c0_9] : memref<8x128xf32, #tpu.memory_space<vmem>>, vector<8x128xf32>
      %c0_10 = arith.constant 0 : index
      %c0_11 = arith.constant 0 : index
      %13 = vector.load %arg5[%c0_10, %c0_11] : memref<1x128xf32, #tpu.memory_space<vmem>>, vector<1x128xf32>
      %14 = vector.broadcast %13 : vector<1x128xf32> to vector<8x128xf32>
      %15 = arith.addf %12, %14 : vector<8x128xf32>
      %c0_12 = arith.constant 0 : index
      %c0_13 = arith.constant 0 : index
      %16 = vector.load %arg6[%c0_12, %c0_13] : memref<8x128xf32, #tpu.memory_space<vmem>>, vector<8x128xf32>
      tpu.vector_store %arg6[%c0_12, %c0_13], %15 {strides = array<i32>} : memref<8x128xf32, #tpu.memory_space<vmem>>, vector<8x128xf32>,
    } else {
    }
    return
  }
  func.func @transform_0(%arg0: i32, %arg1: i32, %arg2: i32) -> (i32, i32) {
    %c0_i32 = arith.constant 0 : i32
    return %arg0, %arg2 : i32, i32
  }
  func.func @transform_1(%arg0: i32, %arg1: i32, %arg2: i32) -> (i32, i32) {
    %c0_i32 = arith.constant 0 : i32
    return %arg2, %arg1 : i32, i32
  }
  func.func @transform_2(%arg0: i32, %arg1: i32, %arg2: i32) -> (i32, i32) {
    %c0_i32 = arith.constant 0 : i32
    %c0_i32_0 = arith.constant 0 : i32
    return %c0_i32, %arg1 : i32, i32
  }
  func.func @transform_3(%arg0: i32, %arg1: i32, %arg2: i32) -> (i32, i32) {
    %c0_i32 = arith.constant 0 : i32
    return %arg0, %arg1 : i32, i32
  }
}

</mosaic_0001>

<bundles_post_ra>
// kernel: _linear_fwd.1
= control target key start
LH: loop header
LB: loop body
LE: loop exit
PB: predicated region body
PF: predicated region fallthrough
CT: control target
= control target key end

     0   :  { %8 = vsyncpa [#allocation4], 0  ;;  %s922_s0 = inlined_call_operand.vmem [shape: f32[16,128], index: 0, kind: input, shape index: {}]   ;;  %s923_s1 = inlined_call_operand.hbm [shape: f32[128,128], index: 1, kind: input, shape index: {}]   ;;  %s924_s2 = inlined_call_operand.vmem [shape: f32[1,128], index: 2, kind: input, shape index: {}]   ;;  %s925_s3 = inlined_call_operand.hbm [shape: f32[16,128], index: 3, kind: output, shape index: {}]  }
   0x1   :  { %9 = vsyncpa [#allocation5], 0 }
   0x2   :  { %11 = vsyncpa [#allocation5 + $0x1], 0  ;;  %s769_s12 = smov 0   ;;  %s771_s13 = smov 0  }
   0x3   :  { %s773_s14 = smov 0   ;;  %s775_s15 = smov 0  }
   0x4   :  { %s777_s16 = smov 0   ;;  %s779_s17 = smov 0  }
   0x5 LB: > { %s468_s18 = sadd.s32 4294967295, %s740_s17   ;;  %s469_s19 = sadd.s32 4294967294, %s740_s17   ;;  %s740_s17 = sphi %s779_s17, %s17_s17   ;;  %s736_s16 = sphi %s777_s16, %s943_s16   ;;  %s732_s15 = sphi %s775_s15, %s942_s15   ;;  %s728_s14 = sphi %s773_s14, %s941_s14   ;;  %s724_s13 = sphi %s771_s13, %s940_s13   ;;  %s720_s12 = sphi %s769_s12, %s939_s12  }
   0x6   : > { %s36_s20 = sadd.s32 1, %s736_s16  ;;  %s127_s21 = sadd.s32 1, %s728_s14 }
   0x7   : > { %p38_p0 = scmp.ge.s32.totalorder %s36_s20, 2  ;;  %p137_p1 = scmp.ne.s32.totalorder %s728_s14, %s724_s13 }
   0x8   : > { %p138_p2 = scmp.eq.s32.totalorder %s468_s18, 1  ;;  %p143_p3 = scmp.ne.s32.totalorder %s724_s13, %s720_s12 }
   0x9   : > { %s945_s20 = smov (%p38_p0, %s36_s20), 0  ;;  %p144_p5 = scmp.eq.s32.totalorder %s469_s19, 1 }
   0xa   : > { %p809_p4 = por %p138_p2, %p137_p1  ;;  %s122_s23 = ssub.s32 %s736_s16, %s945_s20 }
   0xb   : > { %p470_p6 = scmp.ge.s32.totalorder %s740_s17, 1  ;;  %p125_p7 = scmp.eq.s32.totalorder %s122_s23, 0 }
   0xc   : > { %s930_s22 = scalar_select %p809_p4, 1, 0 }
   0xd   : > { %p816_p8 = por %p144_p5, %p143_p3  ;;  %p151_p9 = scmp.lt.s32.totalorder %s740_s17, 3 }
   0xe   : > { %s822_s25 = scalar_select %p125_p7, %s728_s14, %s127_s21  }
   0xf   : > { %s931_s24 = scalar_select %p816_p8, 1, 0 }
  0x10   : > { %p824_p10 = pnand %p470_p6, %p151_p9  ;;  %p828_p11 = scmp.eq.s32.totalorder %s468_s18, 0 }
  0x11   : > { %s742_s28 = smov [#allocation3]   ;;  %s630_s6 = scalar_lea.hbm %s923_s1, 2048 }
  0x12   : > { %s932_s26 = scalar_select %p824_p10, 1, 0 }
  0x13   : > { %s933_s27 = scalar_select %p828_p11, 1, 0 }
  0x14   : > { %p565_p12 = pneg %p824_p10  ;;  %s167_s29 = sshll.u32 %s742_s28, 4  ;;  %s168_s29 = int_to_ptr.vmem [resolvable:$true] %s167_s29 }
  0x15   : > { %p631_p0 = scmp.ne.s32.totalorder %s923_s1, %s630_s6  ;;  %p637_p5 = scmp.lt.u32.totalorder %s630_s6, %s923_s1 }
  0x16   : > { %p836_p13 = pnand %p828_p11, %p565_p12 }
  0x18   : > { %p632_p1 = pneg %p836_p13 }
  0x1a   : > { %p633_p2 = pnand %p632_p1, %p631_p0 }
  0x1c   : > { %p634_p3 = pneg %p633_p2 }
  0x1e   : > { %p639_p6 = pnand %p637_p5, %p634_p3 }
  0x20   : > { %642 = shalt.err (!%p639_p6)
}
  0x21   : > { %s643_s11 = scalar_lea.vmem %s168_s29, 2048  ;;  %p651_p8 = scmp.lt.s32.totalorder %s168_s29, %s168_s29 }
  0x22   : > { %p644_p7 = scmp.ne.s32.totalorder %s168_s29, %s643_s11  ;;  %p652_p4 = scmp.lt.s32.totalorder %s643_s11, %s643_s11 }
  0x24   : > { %p646_p9 = pnand %p644_p7, %p632_p1  ;;  %p653_p11 = por %p652_p4, %p651_p8 }
  0x26   : > { %p647_p12 = pneg %p646_p9 }
  0x28   : > { %p654_p10 = pnand %p653_p11, %p647_p12 }
  0x2a   : > { %657 = shalt.err (!%p654_p10)
}
  0x2b   : > { %s743_s18 = smov 128   ;;  %s744_s19 = smov 8  }
  0x2c   : > { %568 = dma.hbm_to_vmem [thread:$0]  (!%p836_p13), %s923_s1, 2048, %s168_s29, [#allocation4], %s743_s18, %s743_s18, %s744_s19  }
  0x2d   : > { %p935_p0 = scmp.ne.s32.totalorder %s932_s26, 0 }
  0x2e   : > { %p936_p2 = scmp.ne.s32.totalorder (!%p935_p0), %s933_s27, 0 }
  0x2f   : > { %199 = sbr.rel (%p935_p0) target bundleno = 318 (0x13e), region = 32 }
  0x36   : > { %711 = dma.done.wait (%p936_p2), [#allocation4], 2048  }
  0x37   : > { %713 = vsyncadd (%p936_p2), [#allocation4], 4294965248  ;;  %v745_v0 = vmov 0.0|0.0   ;;  %vm746_vm0 = vmmov 0   ;;  %v747_v1 = vmov 0.0   ;;  %v240_v2 = vld [vmem:[#allocation3] sm:$0xff] }
  0x38   : > { %535 = vmatprep.subr.bf16.mxu0 %v745_v0  ;;  %532 = vmatprep.mubr.msk.f32.mxu0 %vm746_vm0, %v747_v1  ;;  %v241_v3 = vld [vmem:[#allocation3 + $0x8] sm:$0xff]  ;;  %v242_v4 = vld [vmem:[#allocation3 + $0x10] sm:$0xff]  ;;  %v243_v6 = vld [vmem:[#allocation3 + $0x18] sm:$0xff]  ;;  %p228_p4 = scmp.lt.s32.totalorder %s732_s15, 1  ;;  %s225_s4 = sand.u32 1, %s724_s13  }
  0x39   : > { %v536_v5 = vpack.c.bf16 %v241_v3, %v240_v2  ;;  %v539_v7 = vpack.c.bf16 %v243_v6, %v242_v4  ;;  %v244_v8 = vld [vmem:[#allocation3 + $0x20] sm:$0xff]  ;;  %v245_v9 = vld [vmem:[#allocation3 + $0x28] sm:$0xff]  ;;  %v246_v11 = vld [vmem:[#allocation3 + $0x30] sm:$0xff]  ;;  %s476_s5 = sshll.u32 %s225_s4, 3  ;;  %s480_s8 = sshll.u32 %s732_s15, 7 }
  0x3a   : > { %v542_v10 = vpack.c.bf16 %v245_v9, %v244_v8  ;;  %v247_v12 = vld [vmem:[#allocation3 + $0x38] sm:$0xff]  ;;  %v248_v14 = vld [vmem:[#allocation3 + $0x40] sm:$0xff]  ;;  %v249_v15 = vld [vmem:[#allocation3 + $0x48] sm:$0xff]  ;;  %s229_s26 = scalar_select %p228_p4, %s732_s15, 1 }
  0x3b   : > { %537 = vmatpush3.bf16.msra.mxu0 %v536_v5  ;;  %v545_v13 = vpack.c.bf16 %v247_v12, %v246_v11  ;;  %v548_v16 = vpack.c.bf16 %v249_v15, %v248_v14  ;;  %v250_v17 = vld [vmem:[#allocation3 + $0x50] sm:$0xff]  ;;  %v251_v18 = vld [vmem:[#allocation3 + $0x58] sm:$0xff]  ;;  %v252_v20 = vld [vmem:[#allocation3 + $0x60] sm:$0xff]  ;;  %s227_s9 = scalar_lea.vmem [#allocation6], %s476_s5  ;;  %s875_s19 = scalar_lea.hbm %s925_s3, %s480_s8 }
  0x3c   : > { %538 = vmatprep.subr.bf16.mxu0 %v745_v0  ;;  %v551_v19 = vpack.c.bf16 %v251_v18, %v250_v17  ;;  %v253_v21 = vld [vmem:[#allocation3 + $0x68] sm:$0xff]  ;;  %v254_v23 = vld [vmem:[#allocation3 + $0x70] sm:$0xff]  ;;  %v255_v24 = vld [vmem:[#allocation3 + $0x78] sm:$0xff]  ;;  %s477_s27 = sshll.u32 %s229_s26, 3  ;;  %s366_s10 = sshll.u32 %s227_s9, 4  ;;  %s877_s10 = int_to_ptr.vmem [resolvable:$true] %s366_s10 }
  0x3d   : > { %v554_v22 = vpack.c.bf16 %v253_v21, %v252_v20  ;;  %v557_v25 = vpack.c.bf16 %v255_v24, %v254_v23  ;;  %s234_s30 = scalar_lea.vmem %s922_s0, %s477_s27  ;;  %v478_v27 = vld [vmem:[%s924_s2] ss:$0 sm:$0xff]  ;;  %s352_s21 = scalar_lea.sflag [#allocation5], %s225_s4 }
  0x3e   : > { %v239_v26 = vld [vmem:[%s234_s30] sm:$0xff]  ;;  %s658_s23 = scalar_lea.vmem %s877_s10, 128  ;;  %p937_p10 = scmp.ne.s32.totalorder %s930_s22, 0 }
  0x3f   : > { %540 = vmatpush3.bf16.msra.mxu0 %v539_v7  ;;  %p659_p8 = scmp.ne.s32.totalorder %s877_s10, %s658_s23  ;;  %s748_s15 = smov [#allocation6]  }
  0x40   : > { %541 = vmatprep.subr.bf16.mxu0 %v745_v0  ;;  %s662_s26 = sshll.u32 %s748_s15, 4  ;;  %s663_s26 = int_to_ptr.vmem [resolvable:$false] %s662_s26 }
  0x41   : > { %p660_p11 = pnand %p659_p8, %p937_p10  ;;  %s664_s27 = scalar_lea.vmem %s663_s26, 256 }
  0x42   : > { %p665_p1 = scmp.lt.s32.totalorder %s877_s10, %s663_s26  ;;  %p666_p3 = scmp.lt.s32.totalorder %s664_s27, %s658_s23 }
  0x43   : > { %543 = vmatpush3.bf16.msra.mxu0 %v542_v10  ;;  %p661_p13 = pneg %p660_p11 }
  0x44   : > { %544 = vmatprep.subr.bf16.mxu0 %v745_v0  ;;  %p667_p5 = por %p666_p3, %p665_p1 }
  0x46   : > { %p668_p6 = pnand %p667_p5, %p661_p13 }
  0x47   : > { %546 = vmatpush3.bf16.msra.mxu0 %v545_v13 }
  0x48   : > { %547 = vmatprep.subr.bf16.mxu0 %v745_v0 }
  0x4b   : > { %549 = vmatpush3.bf16.msra.mxu0 %v548_v16 }
  0x4c   : > { %550 = vmatprep.subr.bf16.mxu0 %v745_v0 }
  0x4f   : > { %552 = vmatpush3.bf16.msra.mxu0 %v551_v19 }
  0x50   : > { %553 = vmatprep.subr.bf16.mxu0 %v745_v0 }
  0x53   : > { %555 = vmatpush3.bf16.msra.mxu0 %v554_v22 }
  0x54   : > { %556 = vmatprep.subr.bf16.mxu0 %v745_v0 }
  0x57   : > { %558 = vmatpush3.bf16.msra.mxu0 %v557_v25 }
  0x5a   : > { %533 = vmatmul.mubr.f32.vlgmr.msra.gmra.mrb[0].mxu0 %v239_v26 }
 0x12d   : > { %v322_v28 = vpop.f32.mrb[0].mxu0 }
 0x12e   : > { %v349_v29 = vadd.f32 %v478_v27, %v322_v28  ;;  %v534_v30 = vpop.f32.mrb[1].mxu0 }
 0x130   : > { %350 = vst [vmem:[%s227_s9] sm:$0xff] %v349_v29 }
 0x131   : > { %671 = shalt.err (!%p668_p6)
}
 0x132   : > { %s672_s28 = scalar_lea.hbm %s875_s19, 128  ;;  %s676_s4 = scalar_lea.hbm %s925_s3, 256 }
 0x133   : > { %p673_p7 = scmp.ne.s32.totalorder %s875_s19, %s672_s28  ;;  %p677_p0 = scmp.lt.u32.totalorder %s875_s19, %s925_s3 }
 0x134   : > { %p678_p2 = scmp.lt.u32.totalorder %s676_s4, %s672_s28  ;;  %p680_p8 = scmp.lt.u32.totalorder %s672_s28, %s875_s19 }
 0x135   : > { %p674_p9 = pnand %p673_p7, %p937_p10 }
 0x136   : > { %p679_p4 = por %p678_p2, %p677_p0 }
 0x137   : > { %p675_p12 = pneg %p674_p9 }
 0x138   : > { %p681_p11 = por %p680_p8, %p679_p4 }
 0x13a   : > { %p682_p13 = pnand %p681_p11, %p675_p12 }
 0x13c   : > { %685 = shalt.err (!%p682_p13)
}
 0x13d   : > { %563 = dma.vmem_to_hbm [thread:$0]  (%p937_p10), %s877_s10, 128, %s875_s19, %s352_s21  }
 0x13e PF: > { %p575_p1 = scmp.ge.s32.totalorder %s740_s17, 2  ;;  %s378_s7 = sand.u32 1, %s720_s12  }
 0x13f   : > { %p938_p3 = scmp.ne.s32.totalorder %s931_s24, 0  ;;  %s379_s8 = scalar_lea.sflag [#allocation5], %s378_s7 }
 0x141   : > { %p570_p5 = pnand %p575_p1, %p938_p3 }
 0x143   : > { %715 = dma.done.wait (!%p570_p5), %s379_s8, 128  }
 0x144   : > { %717 = vsyncadd (!%p570_p5), %s379_s8, 4294967168  ;;  %s17_s17 = sadd.s32 1, %s740_s17   ;;  %s939_s12 = smov %s724_s13 }
 0x145   : > { %p14_p6 = scmp.ge.s32.totalorder %s17_s17, 4   ;;  %s940_s13 = smov %s728_s14 }
 0x146   : > { %s941_s14 = smov %s822_s25  ;;  %s942_s15 = smov %s736_s16 }
 0x147   : > { %s943_s16 = smov %s945_s20  ;;  %16 = sbr.rel (!%p14_p6) target bundleno = 5 (0x5), region = 88 }
 0x14e   :  { %384 = vsyncpa [#allocation4], 1 }
 0x14f   :  { %386 = vsyncpa [#allocation4 + $0x1], 1 }
 0x150   :  { %387 = vsyncpa [#allocation5], 1 }
 0x151   :  { %389 = vsyncpa [#allocation5 + $0x1], 1 }

</bundles_post_ra>
